<compile_context>
chip_gen: v7x
topology: tpu7x:2x2x1
jax: 0.10.0
libtpu: 0.0.40
codegen_flags: <defaults>
</compile_context>

<pallas_src>
import functools
import math

import jax
import jax.numpy as jnp
from jax.experimental import pallas as pl
from jax.experimental.pallas import tpu as pltpu


_LANE = 128          # lane-axis alignment for block last dims
_SUB = 16            # sublane-axis alignment safe for both bf16 and f32 blocks
_MAX_FALLBACK_BLOCK = 4096


def _default_vmem_limit():
    # v5e/v6e have 128 MiB VMEM per TC, v7x only 64 MiB; keep headroom for Mosaic scratch.
    try:
        cap = int(pltpu.get_tpu_info().vmem_capacity_bytes)
    except Exception:
        cap = 64 * 1024 * 1024
    return min(int(cap * 0.7), 100 * 1024 * 1024)


_VMEM_LIMIT = _default_vmem_limit()


def _vmem():
    return pl.BlockSpec(memory_space=pltpu.MemorySpace.VMEM)


def _cparams(sem):
    return pltpu.CompilerParams(dimension_semantics=sem, vmem_limit_bytes=_VMEM_LIMIT)


def _pick_tile(dim, pref, align):
    """Largest multiple of `align` that divides `dim` and is <= pref; else the full dim (capped)."""
    if dim <= pref:
        return dim
    t = (pref // align) * align
    while t >= align:
        if dim % t == 0:
            return t
        t -= align
    if dim > _MAX_FALLBACK_BLOCK:
        raise ValueError(
            f"_pick_tile: no {align}-aligned divisor of {dim} <= {pref}; pad the dimension "
            f"to a multiple of {align} instead of falling back to a {dim}-wide block.")
    return dim


# ----------------------------------------------------------------------------
# Generic tiled linear:  y = x @ w + b   (used for the padded classifier head)
# ----------------------------------------------------------------------------
def _linear_kernel(x_ref, w_ref, b_ref, o_ref, acc_ref):
    k = pl.program_id(2)

    @pl.when(k == 0)
    def _():
        acc_ref[...] = jnp.zeros_like(acc_ref)

    acc_ref[...] += jnp.dot(x_ref[...], w_ref[...], preferred_element_type=jnp.float32)

    @pl.when(k == pl.num_programs(2) - 1)
    def _():
        o_ref[...] = (acc_ref[...] + b_ref[...]).astype(o_ref.dtype)


def pallas_linear(x, w, b, out_dtype=jnp.bfloat16, tm_pref=256, tn_pref=768, tk_pref=1024):
    M, K = x.shape
    N = w.shape[1]
    tm = _pick_tile(M, tm_pref, _SUB)
    tn = _pick_tile(N, tn_pref, _LANE)
    tk = _pick_tile(K, tk_pref, _LANE)
    cost = pl.CostEstimate(
        flops=2 * M * N * K, transcendentals=0,
        bytes_accessed=int(x.size * x.dtype.itemsize + w.size * w.dtype.itemsize
                           + M * N * jnp.dtype(out_dtype).itemsize))
    return pl.pallas_call(
        _linear_kernel,
        grid=(M // tm, N // tn, K // tk),
        in_specs=[
            pl.BlockSpec((tm, tk), lambda i, j, k: (i, k)),
            pl.BlockSpec((tk, tn), lambda i, j, k: (k, j)),
            pl.BlockSpec((1, tn), lambda i, j, k: (0, j)),
        ],
        out_specs=pl.BlockSpec((tm, tn), lambda i, j, k: (i, j)),
        out_shape=jax.ShapeDtypeStruct((M, N), out_dtype),
        scratch_shapes=[pltpu.VMEM((tm, tn), jnp.float32)],
        compiler_params=_cparams(("parallel", "parallel", "arbitrary")),
        cost_estimate=cost,
    )(x, w, b.reshape(1, N).astype(jnp.float32))


# ----------------------------------------------------------------------------
# Fused QKV projection straight into head-major layout:
#   out[s, m, :] = x[m] @ w_heads[s] + b_heads[s]   for s in [0, 3*num_heads)
# (Q slots carry the folded 1/sqrt(dh) scale.)  No split_heads transpose afterwards.
# ----------------------------------------------------------------------------
def _qkv_proj_kernel(x_ref, w_ref, b_ref, o_ref, acc_ref):
    k = pl.program_id(2)

    @pl.when(k == 0)
    def _():
        acc_ref[...] = jnp.zeros_like(acc_ref)

    acc_ref[...] += jnp.dot(x_ref[...], w_ref[0], preferred_element_type=jnp.float32)

    @pl.when(k == pl.num_programs(2) - 1)
    def _():
        o_ref[0] = (acc_ref[...] + b_ref[0]).astype(o_ref.dtype)


def pallas_qkv_proj(x, w_heads, b_heads, out_dtype=jnp.bfloat16, tm_pref=256, tk_pref=1024):
    M, K = x.shape
    S, _, dh = w_heads.shape               # S = 3 * num_heads
    tm = _pick_tile(M, tm_pref, _SUB)
    tk = _pick_tile(K, tk_pref, _LANE)     # full K for H<=1024 -> single reduction step
    cost = pl.CostEstimate(
        flops=2 * M * K * S * dh, transcendentals=0,
        bytes_accessed=int(x.size * x.dtype.itemsize
                           + w_heads.size * w_heads.dtype.itemsize * max(1, M // tm)
                           + S * M * dh * jnp.dtype(out_dtype).itemsize))
    return pl.pallas_call(
        _qkv_proj_kernel,
        grid=(M // tm, S, K // tk),
        in_specs=[
            pl.BlockSpec((tm, tk), lambda i, s, k: (i, k)),        # resident across s if K//tk==1
            pl.BlockSpec((1, tk, dh), lambda i, s, k: (s, k, 0)),
            pl.BlockSpec((1, 1, dh), lambda i, s, k: (s, 0, 0)),
        ],
        out_specs=pl.BlockSpec((1, tm, dh), lambda i, s, k: (s, i, 0)),
        out_shape=jax.ShapeDtypeStruct((S, M, dh), out_dtype),
        scratch_shapes=[pltpu.VMEM((tm, dh), jnp.float32)],
        compiler_params=_cparams(("parallel", "parallel", "arbitrary")),
        cost_estimate=cost,
    )(x, w_heads, b_heads)


# ----------------------------------------------------------------------------
# Flash attention over the head-major QKV tensor (3*nh, B, L, dh).
# Grid (batch, head, q-tile, kv-tile); online softmax over kv tiles; additive (B,1,L)
# mask bias; 1/sqrt(dh) already folded into Q; EUP reciprocal for the denominator.
# Output is head-major (nh, B, L, dh) so the output projection needs no merge transpose.
# ----------------------------------------------------------------------------
def _flash_attn_kernel(q_ref, k_ref, v_ref, bias_ref, o_ref, m_sc, l_sc, acc_sc):
    ki = pl.program_id(3)

    @pl.when(ki == 0)
    def _():
        m_sc[...] = jnp.full_like(m_sc, -jnp.inf)
        l_sc[...] = jnp.zeros_like(l_sc)
        acc_sc[...] = jnp.zeros_like(acc_sc)

    q = q_ref[0, 0]                                   # (tq, dh) bf16, pre-scaled
    k = k_ref[0, 0]                                   # (tk, dh) bf16
    # TODO(synk): a (dh, L)-laid-out K (written transposed by the projection) would feed
    # the MXU without the implicit per-tile K transpose of this contracting-(1,1) form.
    s = jax.lax.dot_general(q, k, (((1,), (1,)), ((), ())),
                            preferred_element_type=jnp.float32)      # (tq, tk)
    s = s + bias_ref[0]                               # (1, tk) additive padding-mask bias

    m_prev = m_sc[...]
    m_new = jnp.maximum(m_prev, jnp.max(s, axis=-1, keepdims=True))
    p = jnp.exp(s - m_new)
    alpha = jnp.exp(m_prev - m_new)
    l_sc[...] = alpha * l_sc[...] + jnp.sum(p, axis=-1, keepdims=True)
    acc_sc[...] = alpha * acc_sc[...] + jnp.dot(p.astype(v_ref.dtype), v_ref[0, 0],
                                                preferred_element_type=jnp.float32)
    m_sc[...] = m_new

    @pl.when(ki == pl.num_programs(3) - 1)
    def _():
        o_ref[0, 0] = (acc_sc[...] * pl.reciprocal(l_sc[...], approx=True)).astype(o_ref.dtype)


def pallas_flash_attention(qkv, bias, num_heads, tq_pref=512, tk_pref=512):
    S3, B, L, dh = qkv.shape
    nh = num_heads
    tq = _pick_tile(L, tq_pref, _SUB)
    tk = _pick_tile(L, tk_pref, _LANE)
    q_spec = pl.BlockSpec((1, 1, tq, dh), lambda b, h, qi, ki: (h, b, qi, 0))
    k_spec = pl.BlockSpec((1, 1, tk, dh), lambda b, h, qi, ki: (nh + h, b, ki, 0))
    v_spec = pl.BlockSpec((1, 1, tk, dh), lambda b, h, qi, ki: (2 * nh + h, b, ki, 0))
    bias_spec = pl.BlockSpec((1, 1, tk), lambda b, h, qi, ki: (b, 0, ki))
    o_spec = pl.BlockSpec((1, 1, tq, dh), lambda b, h, qi, ki: (h, b, qi, 0))
    return pl.pallas_call(
        _flash_attn_kernel,
        grid=(B, nh, L // tq, L // tk),
        in_specs=[q_spec, k_spec, v_spec, bias_spec],
        out_specs=o_spec,
        out_shape=jax.ShapeDtypeStruct((nh, B, L, dh), qkv.dtype),
        scratch_shapes=[pltpu.VMEM((tq, 1), jnp.float32),
                        pltpu.VMEM((tq, 1), jnp.float32),
                        pltpu.VMEM((tq, dh), jnp.float32)],
        compiler_params=_cparams(("parallel", "parallel", "parallel", "arbitrary")),
    )(qkv, qkv, qkv, bias)


# ----------------------------------------------------------------------------
# Attention output projection + residual add + LayerNorm, as a reduction over heads:
#   y = LN( sum_h ctx[h] @ wo_heads[h] + b + residual )
# ctx arrives head-major straight from the attention kernel (no merge transpose).
# ----------------------------------------------------------------------------
def _attn_out_ln_kernel(ctx_ref, wo_ref, b_ref, r_ref, g_ref, bt_ref, o_ref, acc_ref, *, eps):
    h = pl.program_id(1)

    @pl.when(h == 0)
    def _():
        acc_ref[...] = jnp.zeros_like(acc_ref)

    acc_ref[...] += jnp.dot(ctx_ref[0], wo_ref[0], preferred_element_type=jnp.float32)

    @pl.when(h == pl.num_programs(1) - 1)
    def _():
        y = acc_ref[...] + b_ref[...] + r_ref[...].astype(jnp.float32)
        mu = jnp.mean(y, axis=-1, keepdims=True)
        var = jnp.mean((y - mu) ** 2, axis=-1, keepdims=True)
        o_ref[...] = ((y - mu) * jax.lax.rsqrt(var + eps) * g_ref[...]
                      + bt_ref[...]).astype(o_ref.dtype)


def pallas_attn_out_add_ln(ctx, wo_heads, b, residual, gamma, beta, eps=1e-12,
                           out_dtype=jnp.bfloat16, tm_pref=256):
    nh, M, dh = ctx.shape
    H = wo_heads.shape[2]
    tm = _pick_tile(M, tm_pref, _SUB)
    return pl.pallas_call(
        functools.partial(_attn_out_ln_kernel, eps=eps),
        grid=(M // tm, nh),
        in_specs=[
            pl.BlockSpec((1, tm, dh), lambda i, h: (h, i, 0)),
            pl.BlockSpec((1, dh, H), lambda i, h: (h, 0, 0)),
            pl.BlockSpec((1, H), lambda i, h: (0, 0)),
            pl.BlockSpec((tm, H), lambda i, h: (i, 0)),
            pl.BlockSpec((1, H), lambda i, h: (0, 0)),
            pl.BlockSpec((1, H), lambda i, h: (0, 0)),
        ],
        out_specs=pl.BlockSpec((tm, H), lambda i, h: (i, 0)),
        out_shape=jax.ShapeDtypeStruct((M, H), out_dtype),
        scratch_shapes=[pltpu.VMEM((tm, H), jnp.float32)],
        compiler_params=_cparams(("parallel", "arbitrary")),
    )(ctx, wo_heads, b.reshape(1, H).astype(jnp.float32), residual,
      gamma.reshape(1, H).astype(jnp.float32), beta.reshape(1, H).astype(jnp.float32))


# ----------------------------------------------------------------------------
# Fused FFN + residual add + LayerNorm:  LN(gelu(x @ wi + bi) @ wo2 + bo2 + residual)
# K-tiled over the intermediate dim; the (tokens, 4H) activation never leaves VMEM.
# ----------------------------------------------------------------------------
def _ffn_kernel(x_ref, wi_ref, bi_ref, wo_ref, bo_ref, r_ref, g_ref, bt_ref, o_ref, acc_ref, *, eps):
    k = pl.program_id(1)

    @pl.when(k == 0)
    def _():
        acc_ref[...] = jnp.zeros_like(acc_ref)

    inter = jnp.dot(x_ref[...], wi_ref[...], preferred_element_type=jnp.float32) + bi_ref[...]
    inter = jax.nn.gelu(inter, approximate=True)   # TODO(synk): HF BERT uses exact erf-GELU.
    acc_ref[...] += jnp.dot(inter.astype(wo_ref.dtype), wo_ref[...],
                            preferred_element_type=jnp.float32)

    @pl.when(k == pl.num_programs(1) - 1)
    def _():
        y = acc_ref[...] + bo_ref[...] + r_ref[...].astype(jnp.float32)
        mu = jnp.mean(y, axis=-1, keepdims=True)
        var = jnp.mean((y - mu) ** 2, axis=-1, keepdims=True)
        o_ref[...] = ((y - mu) * jax.lax.rsqrt(var + eps) * g_ref[...]
                      + bt_ref[...]).astype(o_ref.dtype)


def pallas_ffn_add_ln(x, wi, bi, wo2, bo2, residual, gamma, beta, eps=1e-12,
                      out_dtype=jnp.bfloat16, tm_pref=256, ti_pref=512):
    M, H = x.shape
    I = wi.shape[1]
    tm = _pick_tile(M, tm_pref, _SUB)
    ti = _pick_tile(I, ti_pref, _LANE)
    cost = pl.CostEstimate(
        flops=4 * M * H * I, transcendentals=M * I,
        bytes_accessed=int(2 * x.size * x.dtype.itemsize
                           + (wi.size + wo2.size) * wi.dtype.itemsize
                           + M * H * jnp.dtype(out_dtype).itemsize))
    return pl.pallas_call(
        functools.partial(_ffn_kernel, eps=eps),
        grid=(M // tm, I // ti),
        in_specs=[
            pl.BlockSpec((tm, H), lambda i, k: (i, 0)),
            pl.BlockSpec((H, ti), lambda i, k: (0, k)),
            pl.BlockSpec((1, ti), lambda i, k: (0, k)),
            pl.BlockSpec((ti, H), lambda i, k: (k, 0)),
            pl.BlockSpec((1, H), lambda i, k: (0, 0)),
            pl.BlockSpec((tm, H), lambda i, k: (i, 0)),
            pl.BlockSpec((1, H), lambda i, k: (0, 0)),
            pl.BlockSpec((1, H), lambda i, k: (0, 0)),
        ],
        out_specs=pl.BlockSpec((tm, H), lambda i, k: (i, 0)),
        out_shape=jax.ShapeDtypeStruct((M, H), out_dtype),
        scratch_shapes=[pltpu.VMEM((tm, H), jnp.float32)],
        compiler_params=_cparams(("parallel", "arbitrary")),
        cost_estimate=cost,
    )(x, wi, bi.reshape(1, I).astype(jnp.float32), wo2, bo2.reshape(1, H).astype(jnp.float32),
      residual, gamma.reshape(1, H).astype(jnp.float32), beta.reshape(1, H).astype(jnp.float32))


# ----------------------------------------------------------------------------
# Fused embedding add + LayerNorm:  LN(word_emb + (pos_emb + type_emb))
# word gather stays in JAX (bf16 table); no f32 (M,H) intermediate in HBM.
# ----------------------------------------------------------------------------
def _emb_ln_kernel(w_ref, pt_ref, g_ref, b_ref, o_ref, *, eps):
    x = w_ref[0].astype(jnp.float32) + pt_ref[0]
    mu = jnp.mean(x, axis=-1, keepdims=True)
    var = jnp.mean((x - mu) ** 2, axis=-1, keepdims=True)
    o_ref[0] = ((x - mu) * jax.lax.rsqrt(var + eps) * g_ref[...] + b_ref[...]).astype(o_ref.dtype)


def pallas_emb_ln(word, pos_type, gamma, beta, eps=1e-12, out_dtype=jnp.bfloat16, tl_pref=512):
    B, L, H = word.shape
    tl = _pick_tile(L, tl_pref, _SUB)
    return pl.pallas_call(
        functools.partial(_emb_ln_kernel, eps=eps),
        grid=(B, L // tl),
        in_specs=[
            pl.BlockSpec((1, tl, H), lambda b, l: (b, l, 0)),
            pl.BlockSpec((1, tl, H), lambda b, l: (0, l, 0)),
            pl.BlockSpec((1, H), lambda b, l: (0, 0)),
            pl.BlockSpec((1, H), lambda b, l: (0, 0)),
        ],
        out_specs=pl.BlockSpec((1, tl, H), lambda b, l: (b, l, 0)),
        out_shape=jax.ShapeDtypeStruct((B, L, H), out_dtype),
        compiler_params=_cparams(("parallel", "parallel")),
    )(word, pos_type, gamma.reshape(1, H).astype(jnp.float32), beta.reshape(1, H).astype(jnp.float32))


# ----------------------------------------------------------------------------
# CRF log-likelihood kernel (forward algorithm, reduction='sum').
# Time-major: emissions (L,B,T), one-hot tags (L,B,T), mask (L,B,1).
# trans_t[j, i] == transitions[i, j]  (previous tag i -> current tag j)
# TODO(synk): re-layout with batch on the lane axis (T is only ~5-30) for better lane use.
# ----------------------------------------------------------------------------
def _crf_loss_kernel(em_ref, toh_ref, mask_ref, start_ref, end_ref, transt_ref, o_ref):
    L, B, T = em_ref.shape
    start = start_ref[...]       # (1, T)
    end = end_ref[...]           # (1, T)
    trans_t = transt_ref[...]    # (T, T)

    em0 = em_ref[0]
    oh0 = toh_ref[0]
    score0 = jnp.sum(oh0 * (start + em0), axis=1, keepdims=True)   # (B, 1) gold-path score
    alpha0 = start + em0                                           # (B, T) forward variables

    def body(t, carry):
        score, alpha, oh_prev = carry
        em_t = em_ref[t]
        oh_t = toh_ref[t]
        m_t = mask_ref[t]

        tr = jnp.sum(
            jnp.sum(oh_t[:, :, None] * trans_t[None, :, :] * oh_prev[:, None, :], axis=2),
            axis=1, keepdims=True)
        e_sc = jnp.sum(em_t * oh_t, axis=1, keepdims=True)
        score = score + (tr + e_sc) * m_t

        x = alpha[:, None, :] + trans_t[None, :, :] + em_t[:, :, None]   # (B, Tcur, Tprev)
        xm = jnp.max(x, axis=2)
        nxt = jnp.log(jnp.sum(jnp.exp(x - xm[:, :, None]), axis=2)) + xm

        keep = m_t > 0.0
        alpha = jnp.where(keep, nxt, alpha)
        oh_prev = jnp.where(keep, oh_t, oh_prev)
        return score, alpha, oh_prev

    score, alpha, oh_last = jax.lax.fori_loop(1, L, body, (score0, alpha0, oh0))

    score = score + jnp.sum(oh_last * end, axis=1, keepdims=True)
    alpha = alpha + end
    am = jnp.max(alpha, axis=1, keepdims=True)
    log_z = jnp.log(jnp.sum(jnp.exp(alpha - am), axis=1, keepdims=True)) + am
    o_ref[...] = score - log_z


def crf_log_likelihood(emissions, tags, mask, start, end, trans):
    # Assumes mask[:, 0] == 1 (torchcrf requirement).
    B, L, T = emissions.shape
    em = jnp.transpose(emissions, (1, 0, 2)).astype(jnp.float32)
    toh = jnp.transpose(jax.nn.one_hot(tags, T, dtype=jnp.float32), (1, 0, 2))
    m = mask.astype(jnp.float32).T[:, :, None]
    llh = pl.pallas_call(
        _crf_loss_kernel,
        out_shape=jax.ShapeDtypeStruct((B, 1), jnp.float32),
        in_specs=[_vmem()] * 6,
        out_specs=_vmem(),
    )(em, toh, m, start.reshape(1, T), end.reshape(1, T), trans.T)
    return jnp.sum(llh)  # torchcrf default reduction='sum'


# ----------------------------------------------------------------------------
# CRF Viterbi kernel: emits backpointers (L,B,T) + final argmax tag (B,1).
# The scalar backtrace runs in plain JAX outside the kernel (not VPU work).
# ----------------------------------------------------------------------------
def _crf_viterbi_kernel(em_ref, mask_ref, start_ref, end_ref, transt_ref, hist_ref, last_ref):
    L, B, T = em_ref.shape
    start = start_ref[...]
    end = end_ref[...]
    trans_t = transt_ref[...]
    iota_j = jax.lax.broadcasted_iota(jnp.int32, (B, T), 1)
    iota_prev = jax.lax.broadcasted_iota(jnp.int32, (B, T, T), 2)   # hoisted out of the loop

    hist_ref[0] = iota_j            # step 0 has no predecessor; identity backpointer
    score0 = start + em_ref[0]

    def body(t, score):
        em_t = em_ref[t]
        m_t = mask_ref[t]
        x = score[:, None, :] + trans_t[None, :, :]       # (B, Tcur, Tprev)
        best = jnp.max(x, axis=2)
        # first-occurrence argmax over previous tag
        idx = jnp.min(jnp.where(x >= best[:, :, None], iota_prev, T), axis=2)
        nxt = best + em_t
        keep = m_t > 0.0
        hist_ref[t] = jnp.where(keep, idx, iota_j)        # identity backpointer on padded steps
        return jnp.where(keep, nxt, score)

    score = jax.lax.fori_loop(1, L, body, score0)
    score = score + end
    sbest = jnp.max(score, axis=1, keepdims=True)
    last_ref[...] = jnp.min(jnp.where(score >= sbest, iota_j, T), axis=1, keepdims=True)


def crf_viterbi_decode(emissions, mask, start, end, trans):
    B, L, T = emissions.shape
    em = jnp.transpose(emissions, (1, 0, 2)).astype(jnp.float32)
    m = mask.astype(jnp.float32).T[:, :, None]
    hist, last = pl.pallas_call(
        _crf_viterbi_kernel,
        out_shape=(jax.ShapeDtypeStruct((L, B, T), jnp.int32),
                   jax.ShapeDtypeStruct((B, 1), jnp.int32)),
        in_specs=[_vmem()] * 5,
        out_specs=(_vmem(), _vmem()),
    )(em, m, start.reshape(1, T), end.reshape(1, T), trans.T)

    # Scalar backtrace in plain JAX (positions past each length carry the last valid tag).
    def back(cur, hist_t):
        prev = jnp.take_along_axis(hist_t, cur, axis=1)
        return prev, prev

    _, prevs = jax.lax.scan(back, last, hist[1:][::-1])          # prevs[i] -> path[L-2-i]
    path = jnp.concatenate([prevs[::-1], last[None]], axis=0)[:, :, 0]   # (L, B)
    return path.T                                                # (B, L)


# ----------------------------------------------------------------------------
# BERT encoder + token-classification head (built from the Pallas kernels)
# ----------------------------------------------------------------------------
def bert_emissions(params, input_ids, attention_mask, num_heads):
    B, L = input_ids.shape
    hid = params["pos_emb"].shape[1]
    dh = hid // num_heads
    M = B * L

    # embeddings: gather (plain-JAX glue, bf16 table), add + LN fused in the kernel
    word = params["word_emb"][input_ids]                                    # (B, L, H) bf16
    pos_type = (params["pos_emb"][:L] + params["type_emb"][0])[None]        # (1, L, H) f32
    h = pallas_emb_ln(word, pos_type, params["emb_ln_g"], params["emb_ln_b"]).reshape(M, hid)

    # tiny additive mask bias (B, 1, L) — no (B*heads, L, L) mask is ever materialized
    bias = ((1.0 - attention_mask.astype(jnp.float32)) * (-1e9)).reshape(B, 1, L)

    for lp in params["layers"]:
        qkv = pallas_qkv_proj(h, lp["wqkv_h"], lp["bqkv_h"])        # (3*nh, M, dh), head-major
        qkv4 = qkv.reshape(3 * num_heads, B, L, dh)                 # free reshape
        ctx = pallas_flash_attention(qkv4, bias, num_heads)         # (nh, B, L, dh)
        ctx = ctx.reshape(num_heads, M, dh)                         # free reshape
        h = pallas_attn_out_add_ln(ctx, lp["wo_h"], lp["bo"], h, lp["ln1_g"], lp["ln1_b"])
        h = pallas_ffn_add_ln(h, lp["wi"], lp["bi"], lp["wo2"], lp["bo2"], h,
                              lp["ln2_g"], lp["ln2_b"])

    # classifier: weight padded to 128 lanes; slice back to num_labels in JAX
    logits = pallas_linear(h, params["cls_w"], params["cls_b"], out_dtype=jnp.float32)
    return logits[:, :params["num_labels"]].reshape(B, L, params["num_labels"])


def bert_crf_forward(params, input_ids, attention_mask, labels=None, *, num_heads):
    emissions = bert_emissions(params, input_ids, attention_mask, num_heads)
    crf = params["crf"]
    if labels is not None:
        llh = crf_log_likelihood(emissions, labels, attention_mask,
                                 crf["start"], crf["end"], crf["trans"])
        return -llh                                     # loss = -crf(emissions, labels, mask)
    return crf_viterbi_decode(emissions, attention_mask,
                              crf["start"], crf["end"], crf["trans"])


# ----------------------------------------------------------------------------
# Parameters: torch-like init, then a prep pass that builds head-major weights,
# folds the attention scale into Q, pads the classifier, and casts matmul weights to bf16.
# ----------------------------------------------------------------------------
def init_params(key, *, vocab_size, hidden, num_layers, intermediate,
                max_pos, type_vocab, num_labels):
    keys = iter(jax.random.split(key, 256))

    def nrm(shape):
        return 0.02 * jax.random.normal(next(keys), shape, jnp.float32)

    def uni(shape):
        return jax.random.uniform(next(keys), shape, jnp.float32, -0.1, 0.1)

    p = {
        "word_emb": nrm((vocab_size, hidden)),
        "pos_emb": nrm((max_pos, hidden)),
        "type_emb": nrm((type_vocab, hidden)),
        "emb_ln_g": jnp.ones((hidden,), jnp.float32),
        "emb_ln_b": jnp.zeros((hidden,), jnp.float32),
        "layers": [],
        "cls_w": nrm((hidden, num_labels)),
        "cls_b": jnp.zeros((num_labels,), jnp.float32),
        "crf": {
            "start": uni((num_labels,)),
            "end": uni((num_labels,)),
            "trans": uni((num_labels, num_labels)),
        },
    }
    for _ in range(num_layers):
        p["layers"].append({
            "wq": nrm((hidden, hidden)), "bq": jnp.zeros((hidden,), jnp.float32),
            "wk": nrm((hidden, hidden)), "bk": jnp.zeros((hidden,), jnp.float32),
            "wv": nrm((hidden, hidden)), "bv": jnp.zeros((hidden,), jnp.float32),
            "wo": nrm((hidden, hidden)), "bo": jnp.zeros((hidden,), jnp.float32),
            "ln1_g": jnp.ones((hidden,), jnp.float32), "ln1_b": jnp.zeros((hidden,), jnp.float32),
            "wi": nrm((hidden, intermediate)), "bi": jnp.zeros((intermediate,), jnp.float32),
            "wo2": nrm((intermediate, hidden)), "bo2": jnp.zeros((hidden,), jnp.float32),
            "ln2_g": jnp.ones((hidden,), jnp.float32), "ln2_b": jnp.zeros((hidden,), jnp.float32),
        })
    return p


def prepare_params(raw, num_heads):
    """Head-major QKV/WO layouts, scale folded into Q, padded classifier, bf16 matmul weights."""
    hidden = raw["word_emb"].shape[1]
    dh = hidden // num_heads
    num_labels = raw["cls_w"].shape[1]
    n_pad = ((num_labels + _LANE - 1) // _LANE) * _LANE
    scale = 1.0 / math.sqrt(dh)
    bf = lambda x: x.astype(jnp.bfloat16)

    def to_heads(w):   # (H, H): column block per head -> (nh, H, dh)
        return w.reshape(hidden, num_heads, dh).transpose(1, 0, 2)

    p = {
        "word_emb": bf(raw["word_emb"]),
        "pos_emb": raw["pos_emb"], "type_emb": raw["type_emb"],
        "emb_ln_g": raw["emb_ln_g"], "emb_ln_b": raw["emb_ln_b"],
        "cls_w": bf(jnp.pad(raw["cls_w"], ((0, 0), (0, n_pad - num_labels)))),
        "cls_b": jnp.pad(raw["cls_b"], (0, n_pad - num_labels)),
        "num_labels": num_labels,
        "crf": raw["crf"], "layers": [],
    }
    for lp in raw["layers"]:
        wq = to_heads(lp["wq"]) * scale                    # fold 1/sqrt(dh) into Q
        wk = to_heads(lp["wk"])
        wv = to_heads(lp["wv"])
        bq = lp["bq"].reshape(num_heads, 1, dh) * scale
        bk = lp["bk"].reshape(num_heads, 1, dh)
        bv = lp["bv"].reshape(num_heads, 1, dh)
        p["layers"].append({
            "wqkv_h": bf(jnp.concatenate([wq, wk, wv], axis=0)),              # (3nh, H, dh)
            "bqkv_h": jnp.concatenate([bq, bk, bv], axis=0).astype(jnp.float32),  # (3nh, 1, dh)
            "wo_h": bf(lp["wo"].reshape(num_heads, dh, hidden)),              # (nh, dh, H)
            "bo": lp["bo"],
            "ln1_g": lp["ln1_g"], "ln1_b": lp["ln1_b"],
            "wi": bf(lp["wi"]), "bi": lp["bi"],
            "wo2": bf(lp["wo2"]), "bo2": lp["bo2"],
            "ln2_g": lp["ln2_g"], "ln2_b": lp["ln2_b"],
        })
    return p


if __name__ == "__main__":
    B, L = 2, 8
    VOCAB, HIDDEN, LAYERS, HEADS, INTER = 100, 32, 2, 2, 64
    MAX_POS, TYPE_VOCAB, NUM_LABELS = 16, 2, 5

    key = jax.random.PRNGKey(0)
    k_par, k_ids, k_lab = jax.random.split(key, 3)
    raw_params = init_params(k_par, vocab_size=VOCAB, hidden=HIDDEN, num_layers=LAYERS,
                             intermediate=INTER, max_pos=MAX_POS, type_vocab=TYPE_VOCAB,
                             num_labels=NUM_LABELS)
    params = prepare_params(raw_params, num_heads=HEADS)

    input_ids = jax.random.randint(k_ids, (B, L), 0, VOCAB, dtype=jnp.int32)
    attention_mask = jnp.array([[1, 1, 1, 1, 1, 1, 1, 1],
                                [1, 1, 1, 1, 1, 1, 0, 0]], dtype=jnp.int32)
    labels = jax.random.randint(k_lab, (B, L), 0, NUM_LABELS, dtype=jnp.int32)

    # training path: CRF negative log-likelihood loss
    loss = bert_crf_forward(params, input_ids, attention_mask, labels, num_heads=HEADS)
    # inference path: Viterbi decode (padded (B, L) int32 tag array)
    preds = bert_crf_forward(params, input_ids, attention_mask, num_heads=HEADS)

    jax.block_until_ready(loss)
    jax.block_until_ready(preds)
    print("KERNEL_OK")
</pallas_src>

<mosaic_0001>
module attributes {stable_mosaic.version = 11 : i64} {
  func.func @_emb_ln_kernel(%arg0: i32, %arg1: i32, %arg2: memref<1x8x32xbf16, #tpu.memory_space<vmem>>, %arg3: memref<1x8x32xf32, #tpu.memory_space<vmem>>, %arg4: memref<1x32xf32, #tpu.memory_space<vmem>>, %arg5: memref<1x32xf32, #tpu.memory_space<vmem>>, %arg6: memref<1x8x32xbf16, #tpu.memory_space<vmem>>) attributes {dimension_semantics = [#tpu.dimension_semantics<parallel>, #tpu.dimension_semantics<parallel>], iteration_bounds = array<i64: 2, 1>, scalar_prefetch = 0 : i64, scratch_operands = 0 : i64, tpu.core_type = #tpu.core_type<tc>, window_params = [{transform_indices = @transform_0, window_bounds = array<i64: 1, 8, 32>}, {transform_indices = @transform_1, window_bounds = array<i64: 1, 8, 32>}, {pipeline_mode = #tpu.pipeline_mode<synchronous>, transform_indices = @transform_2, window_bounds = array<i64: 1, 32>}, {pipeline_mode = #tpu.pipeline_mode<synchronous>, transform_indices = @transform_3, window_bounds = array<i64: 1, 32>}, {transform_indices = @transform_4, window_bounds = array<i64: 1, 8, 32>}]} {
    %c0 = arith.constant 0 : index
    %c0_0 = arith.constant 0 : index
    %c0_1 = arith.constant 0 : index
    %0 = vector.load %arg2[%c0, %c0_0, %c0_1] : memref<1x8x32xbf16, #tpu.memory_space<vmem>>, vector<1x8x32xbf16>
    %1 = vector.shape_cast %0 : vector<1x8x32xbf16> to vector<8x32xbf16>
    %2 = arith.extf %1 : vector<8x32xbf16> to vector<8x32xf32>
    %c0_2 = arith.constant 0 : index
    %c0_3 = arith.constant 0 : index
    %c0_4 = arith.constant 0 : index
    %3 = vector.load %arg3[%c0_2, %c0_3, %c0_4] : memref<1x8x32xf32, #tpu.memory_space<vmem>>, vector<1x8x32xf32>
    %4 = vector.shape_cast %3 : vector<1x8x32xf32> to vector<8x32xf32>
    %5 = arith.addf %2, %4 : vector<8x32xf32>
    %cst = arith.constant dense<0.000000e+00> : vector<8xf32>
    %6 = vector.multi_reduction <add>, %5, %cst [1] : vector<8x32xf32> to vector<8xf32>
    %7 = vector.shape_cast %6 : vector<8xf32> to vector<8x1xf32>
    %cst_5 = arith.constant 3.200000e+01 : f32
    %8 = vector.broadcast %cst_5 : f32 to vector<8x1xf32>
    %9 = arith.divf %7, %8 : vector<8x1xf32>
    %10 = vector.broadcast %9 : vector<8x1xf32> to vector<8x32xf32>
    %11 = arith.subf %5, %10 : vector<8x32xf32>
    %12 = arith.mulf %11, %11 : vector<8x32xf32>
    %cst_6 = arith.constant dense<0.000000e+00> : vector<8xf32>
    %13 = vector.multi_reduction <add>, %12, %cst_6 [1] : vector<8x32xf32> to vector<8xf32>
    %14 = vector.shape_cast %13 : vector<8xf32> to vector<8x1xf32>
    %cst_7 = arith.constant 3.200000e+01 : f32
    %15 = vector.broadcast %cst_7 : f32 to vector<8x1xf32>
    %16 = arith.divf %14, %15 : vector<8x1xf32>
    %17 = vector.broadcast %9 : vector<8x1xf32> to vector<8x32xf32>
    %18 = arith.subf %5, %17 : vector<8x32xf32>
    %cst_8 = arith.constant 9.99999996E-13 : f32
    %19 = vector.broadcast %cst_8 : f32 to vector<8x1xf32>
    %20 = arith.addf %16, %19 : vector<8x1xf32>
    %21 = math.rsqrt %20 : vector<8x1xf32>
    %22 = vector.broadcast %21 : vector<8x1xf32> to vector<8x32xf32>
    %23 = arith.mulf %18, %22 : vector<8x32xf32>
    %c0_9 = arith.constant 0 : index
    %c0_10 = arith.constant 0 : index
    %24 = vector.load %arg4[%c0_9, %c0_10] : memref<1x32xf32, #tpu.memory_space<vmem>>, vector<1x32xf32>
    %25 = vector.broadcast %24 : vector<1x32xf32> to vector<8x32xf32>
    %26 = arith.mulf %23, %25 : vector<8x32xf32>
    %c0_11 = arith.constant 0 : index
    %c0_12 = arith.constant 0 : index
    %27 = vector.load %arg5[%c0_11, %c0_12] : memref<1x32xf32, #tpu.memory_space<vmem>>, vector<1x32xf32>
    %28 = vector.broadcast %27 : vector<1x32xf32> to vector<8x32xf32>
    %29 = arith.addf %26, %28 : vector<8x32xf32>
    %30 = arith.truncf %29 : vector<8x32xf32> to vector<8x32xbf16>
    %c0_13 = arith.constant 0 : index
    %c0_14 = arith.constant 0 : index
    %c0_15 = arith.constant 0 : index
    %31 = vector.load %arg6[%c0_13, %c0_14, %c0_15] : memref<1x8x32xbf16, #tpu.memory_space<vmem>>, vector<1x8x32xbf16>
    %32 = vector.shape_cast %31 : vector<1x8x32xbf16> to vector<8x32xbf16>
    %33 = vector.shape_cast %30 : vector<8x32xbf16> to vector<1x8x32xbf16>
    tpu.vector_store %arg6[%c0_13, %c0_14, %c0_15], %33 {strides = array<i32>} : memref<1x8x32xbf16, #tpu.memory_space<vmem>>, vector<1x8x32xbf16>,
    return
  }
  func.func @transform_0(%arg0: i32, %arg1: i32) -> (i32, i32, i32) {
    %c0_i32 = arith.constant 0 : i32
    %c0_i32_0 = arith.constant 0 : i32
    return %arg0, %arg1, %c0_i32 : i32, i32, i32
  }
  func.func @transform_1(%arg0: i32, %arg1: i32) -> (i32, i32, i32) {
    %c0_i32 = arith.constant 0 : i32
    %c0_i32_0 = arith.constant 0 : i32
    %c0_i32_1 = arith.constant 0 : i32
    return %c0_i32, %arg1, %c0_i32_0 : i32, i32, i32
  }
  func.func @transform_2(%arg0: i32, %arg1: i32) -> (i32, i32) {
    %c0_i32 = arith.constant 0 : i32
    %c0_i32_0 = arith.constant 0 : i32
    %c0_i32_1 = arith.constant 0 : i32
    return %c0_i32, %c0_i32_0 : i32, i32
  }
  func.func @transform_3(%arg0: i32, %arg1: i32) -> (i32, i32) {
    %c0_i32 = arith.constant 0 : i32
    %c0_i32_0 = arith.constant 0 : i32
    %c0_i32_1 = arith.constant 0 : i32
    return %c0_i32, %c0_i32_0 : i32, i32
  }
  func.func @transform_4(%arg0: i32, %arg1: i32) -> (i32, i32, i32) {
    %c0_i32 = arith.constant 0 : i32
    %c0_i32_0 = arith.constant 0 : i32
    return %arg0, %arg1, %c0_i32 : i32, i32, i32
  }
}

</mosaic_0001>

<bundles_post_ra>
// kernel: tpu_custom_call.1
= control target key start
LH: loop header
LB: loop body
LE: loop exit
PB: predicated region body
PF: predicated region fallthrough
CT: control target
= control target key end

     0   :  { %9 = vsyncpa [#allocation3], 0  ;;  %s887_s0 = inlined_call_operand.hbm [shape: bf16[2,8,32], index: 0, kind: input, shape index: {}]   ;;  %s888_s1 = inlined_call_operand.hbm [shape: f32[1,8,32], index: 1, kind: input, shape index: {}]   ;;  %s889_s2 = inlined_call_operand.vmem [shape: f32[1,32], index: 2, kind: input, shape index: {}]   ;;  %s890_s3 = inlined_call_operand.vmem [shape: f32[1,32], index: 3, kind: input, shape index: {}]   ;;  %s891_s4 = inlined_call_operand.hbm [shape: bf16[2,8,32], index: 4, kind: output, shape index: {}]  }
   0x1   :  { %11 = vsyncpa [#allocation3 + $0x1], 0 }
   0x2   :  { %12 = vsyncpa [#allocation6], 0 }
   0x3   :  { %13 = vsyncpa [#allocation4], 0 }
   0x4   :  { %15 = vsyncpa [#allocation4 + $0x1], 0  ;;  %s661_s15 = smov 0   ;;  %s663_s16 = smov 0  }
   0x5   :  { %s665_s17 = smov 0   ;;  %s667_s18 = smov 0  }
   0x6   :  { %s669_s19 = smov 0   ;;  %s671_s20 = smov 0  }
   0x7 LB: > { %s395_s21 = sadd.s32 4294967295, %s631_s20   ;;  %s396_s22 = sadd.s32 4294967294, %s631_s20   ;;  %s631_s20 = sphi %s671_s20, %s21_s20   ;;  %s627_s19 = sphi %s669_s19, %s916_s19   ;;  %s623_s18 = sphi %s667_s18, %s915_s18   ;;  %s619_s17 = sphi %s665_s17, %s914_s17   ;;  %s615_s16 = sphi %s663_s16, %s913_s16   ;;  %s611_s15 = sphi %s661_s15, %s912_s15  }
   0x8   : > { %p55_p0 = scmp.ne.s32.totalorder %s615_s16, %s611_s15  ;;  %p695_p1 = scmp.eq.s32.totalorder %s395_s21, 0 }
   0x9   : > { %p699_p2 = scmp.eq.s32.totalorder %s395_s21, 1  ;;  %p155_p3 = scmp.eq.s32.totalorder %s396_s22, 1 }
   0xa   : > { %s896_s23 = scalar_select %p695_p1, 1, 0 }
   0xb   : > { %s897_s24 = scalar_select %p699_p2, 1, 0 }
   0xc   : > { %p705_p4 = por %p695_p1, %p55_p0  ;;  %p397_p5 = scmp.ge.s32.totalorder %s631_s20, 1 }
   0xd   : > { %p710_p6 = por %p155_p3, %p55_p0  ;;  %p162_p7 = scmp.lt.s32.totalorder %s631_s20, 3 }
   0xe   : > { %s898_s25 = scalar_select %p705_p4, 1, 0 }
   0xf   : > { %s899_s26 = scalar_select %p710_p6, 1, 0 }
  0x10   : > { %p715_p8 = pnand %p397_p5, %p162_p7  ;;  %s633_s28 = smov [#allocation5]  }
  0x11   : > { %s177_s29 = sshll.u32 %s633_s28, 4  ;;  %s33_s5 = sadd.s32 1, %s627_s19  ;;  %s178_s29 = int_to_ptr.vmem [resolvable:$true] %s177_s29 }
  0x12   : > { %s900_s27 = scalar_select %p715_p8, 1, 0 }
  0x13   : > { %p420_p10 = pneg %p715_p8  ;;  %s42_s6 = sadd.s32 1, %s619_s17 }
  0x14   : > { %p730_p12 = scmp.ge.s32.totalorder %s33_s5, 2  ;;  %s487_s10 = scalar_lea.hbm %s888_s1, 128 }
  0x15   : > { %p724_p11 = pnand %p420_p10, %p695_p1  ;;  %p488_p13 = scmp.ne.s32.totalorder %s888_s1, %s487_s10 }
  0x16   : > { %s902_s7 = scalar_select %p730_p12, 1, 0 }
  0x17   : > { %p489_p0 = pneg %p724_p11  ;;  %p494_p7 = scmp.lt.u32.totalorder %s487_s10, %s888_s1 }
  0x19   : > { %p490_p3 = pnand %p489_p0, %p488_p13 }
  0x1b   : > { %p491_p5 = pneg %p490_p3 }
  0x1d   : > { %p496_p10 = pnand %p494_p7, %p491_p5 }
  0x1f   : > { %499 = shalt.err (!%p496_p10)
}
  0x20   : > { %s500_s21 = scalar_lea.vmem %s178_s29, 128  ;;  %p508_p4 = scmp.lt.s32.totalorder %s178_s29, %s178_s29 }
  0x21   : > { %p501_p9 = scmp.ne.s32.totalorder %s178_s29, %s500_s21  ;;  %p509_p8 = scmp.lt.s32.totalorder %s500_s21, %s500_s21 }
  0x23   : > { %p503_p6 = pnand %p501_p9, %p489_p0  ;;  %p510_p2 = por %p509_p8, %p508_p4 }
  0x25   : > { %p504_p1 = pneg %p503_p6 }
  0x27   : > { %p511_p12 = pnand %p510_p2, %p504_p1 }
  0x29   : > { %514 = shalt.err (!%p511_p12)
}
  0x2a   : > { %423 = dma.hbm_to_vmem [thread:$0]  (!%p724_p11), %s888_s1, 128, %s178_s29, [#allocation6]  }
  0x2b   : > { %p903_p4 = scmp.ne.s32.totalorder %s902_s7, 0  ;;  %p49_p1 = scmp.ne.s32.totalorder %s619_s17, %s615_s16 }
  0x2c   : > { %p50_p2 = scmp.eq.s32.totalorder %s631_s20, 0  ;;  %p433_p6 = scmp.lt.s32.totalorder %s631_s20, 2 }
  0x2d   : > { %s918_s5 = smov (%p903_p4, %s33_s5), 0  ;;  %p904_p12 = scmp.ne.s32.totalorder %s897_s24, 0 }
  0x2e   : > { %s37_s30 = ssub.s32 %s627_s19, %s918_s5  ;;  %p51_p9 = por %p50_p2, %p49_p1 }
  0x2f   : > { %p40_p8 = scmp.eq.s32.totalorder %s37_s30, 0  ;;  %p762_p13 = por %p904_p12, %p49_p1 }
  0x30   : > { %s194_s9 = sand.u32 1, %s619_s17   ;;  %s401_s7 = sshll.u32 %s627_s19, 6 }
  0x31   : > { %s770_s10 = scalar_select %p40_p8, %s619_s17, %s42_s6  }
  0x32   : > { %s400_s29 = sshll.u32 %s194_s9, 2  ;;  %s776_s13 = scalar_lea.hbm %s887_s0, %s401_s7 }
  0x33   : > { %s198_s24 = scalar_lea.vmem [#allocation2], %s400_s29  ;;  %p780_p11 = pnand %p433_p6, %p51_p9 }
  0x34   : > { %s206_s14 = sshll.u32 %s198_s24, 4  ;;  %s195_s6 = scalar_lea.sflag [#allocation3], %s194_s9  ;;  %s778_s14 = int_to_ptr.vmem [resolvable:$true] %s206_s14 }
  0x35   : > { %s515_s22 = scalar_lea.hbm %s776_s13, 64  ;;  %p517_p3 = pneg %p780_p11 }
  0x36   : > { %p516_p0 = scmp.ne.s32.totalorder %s776_s13, %s515_s22  ;;  %s520_s29 = scalar_lea.hbm %s887_s0, 128 }
  0x37   : > { %p521_p10 = scmp.lt.u32.totalorder %s776_s13, %s887_s0  ;;  %p522_p4 = scmp.lt.u32.totalorder %s520_s29, %s515_s22 }
  0x38   : > { %p518_p5 = pnand %p517_p3, %p516_p0  ;;  %p524_p2 = scmp.lt.u32.totalorder %s515_s22, %s776_s13 }
  0x39   : > { %p523_p1 = por %p522_p4, %p521_p10 }
  0x3a   : > { %p519_p7 = pneg %p518_p5 }
  0x3b   : > { %p525_p6 = por %p524_p2, %p523_p1 }
  0x3d   : > { %p526_p8 = pnand %p525_p6, %p519_p7 }
  0x3f   : > { %529 = shalt.err (!%p526_p8)
}
  0x40   : > { %s530_s9 = scalar_lea.vmem %s778_s14, 64  ;;  %s634_s12 = smov [#allocation2]  }
  0x41   : > { %p531_p9 = scmp.ne.s32.totalorder %s778_s14, %s530_s9  ;;  %s535_s24 = sshll.u32 %s634_s12, 4  ;;  %s536_s24 = int_to_ptr.vmem [resolvable:$false] %s535_s24 }
  0x42   : > { %s537_s28 = scalar_lea.vmem %s536_s24, 128  ;;  %p538_p5 = scmp.lt.s32.totalorder %s778_s14, %s536_s24 }
  0x43   : > { %p533_p12 = pnand %p531_p9, %p517_p3  ;;  %p539_p10 = scmp.lt.s32.totalorder %s537_s28, %s530_s9 }
  0x45   : > { %p534_p0 = pneg %p533_p12  ;;  %p540_p4 = por %p539_p10, %p538_p5 }
  0x47   : > { %p541_p1 = pnand %p540_p4, %p534_p0 }
  0x49   : > { %544 = shalt.err (!%p541_p1)
}
  0x4a   : > { %427 = dma.hbm_to_vmem [thread:$0]  (!%p780_p11), %s776_s13, 64, %s778_s14, %s195_s6  }
  0x4b   : > { %p907_p7 = scmp.ne.s32.totalorder %s900_s27, 0 }
  0x4c   : > { %s812_s22 = sand.u32 (!%p907_p7), 1, %s615_s16   ;;  %p908_p3 = scmp.ne.s32.totalorder (!%p907_p7), %s898_s25, 0 }
  0x4d   : > { %215 = sbr.rel (%p907_p7) target bundleno = 422 (0x1a6), region = 36  ;;  %s403_s30 = sshll.u32 (!%p907_p7), %s812_s22, 2 }
  0x4e   : > { %s218_s29 = scalar_lea.sflag (!%p907_p7), [#allocation3], %s812_s22  ;;  %s221_s7 = scalar_lea.vmem (!%p907_p7), [#allocation2], %s403_s30 }
  0x54   : > { %598 = dma.done.wait (%p908_p3), %s218_s29, 64  }
  0x55   : > { %600 = vsyncadd (%p908_p3), %s218_s29, 4294967232  ;;  %p909_p11 = scmp.ne.s32.totalorder %s896_s23, 0 }
  0x57   : > { %602 = dma.done.wait (%p909_p11), [#allocation6], 128  }
  0x58   : > { %604 = vsyncadd (%p909_p11), [#allocation6], 4294967168  ;;  %v250_v0 = vld [vmem:[%s221_s7] sm:$0xf]  ;;  %v252_v1 = vld [vmem:[#allocation5] sm:$0xff]  ;;  %vm254_vm0 = vcmask 261120  }
  0x59   : > { %v251_v2 = vunpack.c.l.bf16 %v250_v0  ;;  %v406_v14 = vld [vmem:[%s889_s2] ss:$0 sm:$0xff]  ;;  %s409_s14 = sshll.u32 %s623_s18, 6  ;;  %s249_s21 = scalar_lea.vmem [#allocation7], %s403_s30  ;;  %vm286_vm1 = vcmask 257024  }
  0x5a   : > { %v407_v16 = vld [vmem:[%s890_s3] ss:$0 sm:$0xff]  ;;  %s303_s6 = sshll.u32 %s249_s21, 4  ;;  %s838_s12 = scalar_lea.hbm %s891_s4, %s409_s14  ;;  %s840_s6 = int_to_ptr.vmem [resolvable:$true] %s303_s6 }
  0x5b   : > { %v253_v3 = vadd.f32 %v252_v1, %v251_v2  ;;  %s289_s24 = scalar_lea.sflag [#allocation4], %s812_s22  ;;  %s545_s28 = scalar_lea.vmem %s840_s6, 64 }
  0x5c   : > { %p546_p2 = scmp.ne.s32.totalorder %s840_s6, %s545_s28  ;;  %s635_s18 = smov [#allocation7]  }
  0x5d   : > { %v255_v4 = vsel %vm254_vm0, %v253_v3, 0.0  ;;  %s549_s30 = sshll.u32 %s635_s18, 4  ;;  %s550_s30 = int_to_ptr.vmem [resolvable:$false] %s549_s30 }
  0x5e   : > { %256 = vadd.xlane.f32.xlu0 %v255_v4  ;;  %p547_p6 = pnand %p546_p2, %p762_p13  ;;  %s551_s29 = scalar_lea.vmem %s550_s30, 128 }
  0x5f   : > { %p552_p9 = scmp.lt.s32.totalorder %s840_s6, %s550_s30  ;;  %p553_p12 = scmp.lt.s32.totalorder %s551_s29, %s545_s28 }
  0x60   : > { %p548_p8 = pneg %p547_p6 }
  0x61   : > { %p554_p0 = por %p553_p12, %p552_p9 }
  0x63   : > { %p555_p5 = pnand %p554_p0, %p548_p8 }
  0xeb   : > { %v257_v5 = vpop.xlane.xlu0 %256 }
  0xec   : > { %v259_v6 = vmul.f32 0.03125, %v257_v5 }
  0xee   : > { %v260_v7 = vsub.f32 %v253_v3, %v259_v6 }
  0xf0   : > { %v261_v8 = vmul.f32 %v260_v7, %v260_v7 }
  0xf2   : > { %v262_v9 = vsel %vm254_vm0, %v261_v8, 0.0 }
  0xf3   : > { %263 = vadd.xlane.f32.xlu0 %v262_v9 }
 0x180   : > { %v264_v10 = vpop.xlane.xlu0 %263 }
 0x181   : > { %v265_v11 = vmul.f32 0.03125, %v264_v10 }
 0x183   : > { %v266_v12 = vadd.f32 1e-12, %v265_v11 }
 0x185   : > { %485 = vrsqrt.f32 %v266_v12 }
 0x18f   : > { %v486_v13 = vpop.eup %485 }
 0x190   : > { %v268_v15 = vmul.f32 %v486_v13, %v260_v7 }
 0x192   : > { %v276_v17 = vmul.f32 %v406_v14, %v268_v15 }
 0x194   : > { %v284_v18 = vadd.f32 %v407_v16, %v276_v17 }
 0x196   : > { %v285_v19 = vpack.c.bf16 %v284_v18, %v284_v18 }
 0x198   : > { %287 = vst.msk [vmem:[%s249_s21] sm:$0xf] %vm286_vm1, %v285_v19 }
 0x199   : > { %558 = shalt.err (!%p555_p5)
}
 0x19a   : > { %s559_s22 = scalar_lea.hbm %s838_s12, 64  ;;  %s563_s25 = scalar_lea.hbm %s891_s4, 128 }
 0x19b   : > { %p560_p10 = scmp.ne.s32.totalorder %s838_s12, %s559_s22  ;;  %p564_p7 = scmp.lt.u32.totalorder %s838_s12, %s891_s4 }
 0x19c   : > { %p565_p3 = scmp.lt.u32.totalorder %s563_s25, %s559_s22  ;;  %p567_p2 = scmp.lt.u32.totalorder %s559_s22, %s838_s12 }
 0x19d   : > { %p561_p4 = pnand %p560_p10, %p762_p13 }
 0x19e   : > { %p566_p11 = por %p565_p3, %p564_p7 }
 0x19f   : > { %p562_p1 = pneg %p561_p4 }
 0x1a0   : > { %p568_p6 = por %p567_p2, %p566_p11 }
 0x1a2   : > { %p569_p8 = pnand %p568_p6, %p562_p1 }
 0x1a4   : > { %572 = shalt.err (!%p569_p8)
}
 0x1a5   : > { %418 = dma.vmem_to_hbm [thread:$0]  (%p762_p13), %s840_s6, 64, %s838_s12, %s289_s24  }
 0x1a6 PF: > { %s315_s14 = sand.u32 1, %s611_s15   ;;  %p910_p9 = scmp.ne.s32.totalorder %s899_s26, 0 }
 0x1a7   : > { %p911_p12 = scmp.ge.s32.totalorder %s631_s20, 2  ;;  %s316_s21 = scalar_lea.sflag [#allocation4], %s315_s14 }
 0x1a9   : > { %p429_p0 = pnand %p911_p12, %p910_p9 }
 0x1ab   : > { %606 = dma.done.wait (!%p429_p0), %s316_s21, 64  }
 0x1ac   : > { %608 = vsyncadd (!%p429_p0), %s316_s21, 4294967232  ;;  %s21_s20 = sadd.s32 1, %s631_s20   ;;  %s912_s15 = smov %s615_s16 }
 0x1ad   : > { %p18_p5 = scmp.ge.s32.totalorder %s21_s20, 4   ;;  %s913_s16 = smov %s619_s17 }
 0x1ae   : > { %s914_s17 = smov %s770_s10  ;;  %s915_s18 = smov %s627_s19 }
 0x1af   : > { %s916_s19 = smov %s918_s5  ;;  %20 = sbr.rel (!%p18_p5) target bundleno = 7 (0x7), region = 86 }
 0x1b6   :  { %321 = vsyncpa [#allocation3], 1 }
 0x1b7   :  { %323 = vsyncpa [#allocation3 + $0x1], 1 }
 0x1b8   :  { %324 = vsyncpa [#allocation6], 1 }
 0x1b9   :  { %325 = vsyncpa [#allocation4], 1 }
 0x1ba   :  { %327 = vsyncpa [#allocation4 + $0x1], 1 }

</bundles_post_ra>
